<compile_context>
chip_gen: v6e
topology: v6e:2x2x1
jax: 0.10.0
libtpu: 0.0.40
codegen_flags: <defaults>
</compile_context>

<pallas_src>
import functools

import jax
import jax.numpy as jnp
from jax import lax
from jax.experimental import pallas as pl
from jax.experimental.pallas import tpu as pltpu

EPS = 1e-8


def _round_up(a: int, m: int) -> int:
    return ((a + m - 1) // m) * m


def _cdiv(a: int, b: int) -> int:
    return (a + b - 1) // b


def _vmem_cap_bytes() -> int:
    # v5e/v6e: 128 MiB physical VMEM per TC; v7x: 64 MiB.
    try:
        return int(pltpu.get_tpu_info().vmem_capacity_bytes)
    except Exception:  # interpret mode / unknown chip -> conservative value
        return 64 << 20


def _cosine2d_kernel(x_ref, y_ref, inv_ynorm_ref, o_ref, acc_ref, xsq_ref, *,
                     D, tK, tD, y_resident, mask_d):
    j = pl.program_id(1)
    d = pl.program_id(2)

    @pl.when(d == 0)
    def _init():
        acc_ref[...] = jnp.zeros_like(acc_ref)
        xsq_ref[...] = jnp.zeros_like(xsq_ref)

    x = x_ref[...]                                        # (tB, tD) native dtype

    if mask_d:
        # x is NOT padded in HBM: zero the garbage lanes of the ragged last D
        # tile before BOTH the dot and the x^2 accumulation.
        col = lax.broadcasted_iota(jnp.int32, x.shape, 1)
        valid = D - d * tD                                # >= tD except last tile
        x = jnp.where(col < valid, x, jnp.zeros_like(x))

    if y_resident:
        # Whole padded y lives in VMEM (single DMA for the entire kernel);
        # take the aligned (tK, tD) slice needed this step.
        koff = pl.multiple_of(j * tK, tK)
        doff = pl.multiple_of(d * tD, tD)
        y = y_ref[pl.ds(koff, tK), pl.ds(doff, tD)]       # (tK, tD)
    else:
        y = y_ref[...]                                    # (tK, tD)

    # Partial dots: contraction over the last dim of both operands (no
    # materialized transpose), f32 MXU accumulation.
    acc_ref[...] += lax.dot_general(
        x, y,
        dimension_numbers=(((1,), (1,)), ((), ())),
        preferred_element_type=jnp.float32,
    )

    # Lane-resident running sum of x^2 over the patch (conv2d(x^2, ones)):
    # accumulate per 128-lane group; single cross-lane reduce at finalize.
    xsq = xsq_ref[...]
    for g in range(tD // 128):
        xg = x[:, g * 128:(g + 1) * 128].astype(jnp.float32)
        xsq = xsq + xg * xg
    xsq_ref[...] = xsq                                    # (tB, 128)

    @pl.when(d == pl.num_programs(2) - 1)
    def _finalize():
        xs = jnp.sum(xsq_ref[...], axis=1, keepdims=True)        # (tB, 1)
        # clamp-then-rsqrt preserves PyTorch's .clamp(min=eps).sqrt() semantics.
        inv_xnorm = lax.rsqrt(jnp.maximum(xs, EPS))               # EUP
        diss = acc_ref[...] * inv_ynorm_ref[...] * inv_xnorm      # (tB, tK)
        o_ref[...] = jnp.maximum(diss, 0.0).astype(o_ref.dtype)   # relu


def cosine_similarity_2d(x, y, *, block_b: int = 512, block_d: int = 2048,
                         block_k: int = 512, compute_dtype=None):
    """x: (B, C, H, W); y: (K, C, h, w) with (C, H, W) == (C, h, w).

    Returns relu'd cosine similarities of shape (B, K, 1, 1), matching the
    PyTorch module's 1x1-output (valid, full-patch filter) configuration.
    `compute_dtype=jnp.bfloat16` is an opt-in lower-precision MXU/HBM path
    (the x^2 sums, inverse norms and accumulator stay in f32).
    """
    B, C, H, W = x.shape
    K, Cy, h, w = y.shape
    assert (C, H, W) == (Cy, h, w), (
        "kernel implements the 1x1-output (valid, full-patch filter) case")
    D = C * H * W

    o_dtype = jnp.promote_types(x.dtype, y.dtype)
    mm_dtype = jnp.dtype(compute_dtype) if compute_dtype is not None else jnp.dtype(o_dtype)

    # ---- dtype-aware alignment ---------------------------------------------
    itemsize = jnp.dtype(mm_dtype).itemsize
    sub = 8 * max(1, 4 // itemsize)          # 8 rows f32 / 16 bf16 / 32 int8

    # ---- tile plan -----------------------------------------------------------
    tB = min(_round_up(B, sub), max(sub, _round_up(block_b, sub)))
    # Megacore (v7x): prefer >= 2 batch blocks so both TensorCores get work.
    if B > sub and _cdiv(B, tB) < 2:
        tB = max(sub, _round_up(_cdiv(B, 2), sub))

    tK = min(_round_up(K, 128), max(128, _round_up(block_k, 128)))
    Kp = _round_up(K, tK)                    # lane-dense output, Kp % tK == 0
    nK = Kp // tK

    tD = min(_round_up(D, 128), max(128, _round_up(block_d, 128)))

    # ---- VMEM budget (per-generation; v7x only has 64 MiB physical) ---------
    cap = _vmem_cap_bytes()
    vmem_limit = max(32 << 20, min(cap * 3 // 4, 100 << 20))
    budget = int(vmem_limit * 0.6)           # leave compiler headroom

    o_isz = jnp.dtype(o_dtype).itemsize

    def _plan(tb, td):
        dp = _round_up(D, td)
        y_res = 2 * Kp * dp * itemsize <= budget // 2
        y_bytes = 2 * Kp * dp * itemsize if y_res else 2 * tK * td * itemsize
        use = (2 * tb * td * itemsize        # x double buffer
               + y_bytes                     # y (resident or tiled)
               + 2 * tb * tK * o_isz         # output double buffer
               + tb * tK * 4                 # f32 accumulator
               + tb * 128 * 4                # lane-resident x^2 partials
               + 2 * tK * 4)                 # inv_ynorm
        return dp, y_res, use

    Dp, y_resident, use = _plan(tB, tD)
    while use > budget and (tD > 128 or tB > sub):
        if tD > 128:
            tD = max(128, _round_up(tD // 2, 128))
        else:
            tB = max(sub, _round_up(tB // 2, sub))
        Dp, y_resident, use = _plan(tB, tD)

    nB = _cdiv(B, tB)
    nD = _cdiv(D, tD)
    mask_d = (D % tD) != 0

    # ---- operands ------------------------------------------------------------
    # x: no pad / no HBM copy (free metadata reshape); ragged tiles are masked
    # in-kernel.  Cast only when the opt-in reduced-precision path is used.
    x2 = x.reshape(B, D)
    if x2.dtype != mm_dtype:
        x2 = x2.astype(mm_dtype)

    # y is tiny (K*D): pad once to (Kp, Dp) so in-kernel slices stay in bounds
    # and padded rows/lanes contribute exactly zero.
    yf = y.reshape(K, D).astype(jnp.float32)
    y2 = jnp.pad(y.reshape(K, D), ((0, Kp - K), (0, Dp - D))).astype(mm_dtype)

    # Hoisted per-component inverse norms (K rsqrts in f32); padded columns 0.
    inv_ynorm = lax.rsqrt(jnp.maximum(jnp.sum(yf * yf, axis=1), EPS))
    inv_ynorm = jnp.pad(inv_ynorm, (0, Kp - K)).reshape(1, Kp)

    # ---- BlockSpecs ----------------------------------------------------------
    if y_resident:
        # Constant block index -> Pallas DMAs y exactly once for the whole
        # kernel (no re-streaming per B tile).
        y_spec = pl.BlockSpec((Kp, Dp), lambda i, j, d: (0, 0))
    else:
        # Fallback for very large K*D: stream (tK, tD) tiles (re-read per B
        # tile; larger block_b shrinks the re-read factor).
        y_spec = pl.BlockSpec((tK, tD), lambda i, j, d: (j, d))

    kernel = functools.partial(
        _cosine2d_kernel, D=D, tK=tK, tD=tD,
        y_resident=y_resident, mask_d=mask_d)

    out = pl.pallas_call(
        kernel,
        out_shape=jax.ShapeDtypeStruct((B, Kp), o_dtype),
        grid_spec=pltpu.PrefetchScalarGridSpec(
            num_scalar_prefetch=0,
            grid=(nB, nK, nD),
            in_specs=[
                pl.BlockSpec((tB, tD), lambda i, j, d: (i, d)),   # x tile
                y_spec,                                           # y
                pl.BlockSpec((1, tK), lambda i, j, d: (0, j)),    # inv y norms
            ],
            out_specs=pl.BlockSpec((tB, tK), lambda i, j, d: (i, j)),
            scratch_shapes=[
                pltpu.VMEM((tB, tK), jnp.float32),    # dot-product accumulator
                pltpu.VMEM((tB, 128), jnp.float32),   # lane-resident x^2 sums
            ],
        ),
        compiler_params=pltpu.CompilerParams(
            dimension_semantics=("parallel", "parallel", "arbitrary"),
            vmem_limit_bytes=int(vmem_limit),
        ),
    )(x2, y2, inv_ynorm)

    return out[:, :K].reshape(B, K, 1, 1)


def _reference(x, y):
    """Pure-JAX reference mirroring the PyTorch forward (1x1-output case)."""
    B = x.shape[0]
    K = y.shape[0]
    xf = x.reshape(B, -1).astype(jnp.float32)
    yf = y.reshape(K, -1).astype(jnp.float32)
    normed_y = yf / jnp.sqrt(jnp.clip(jnp.sum(yf * yf, axis=1, keepdims=True), EPS))
    x_norm = jnp.sqrt(jnp.clip(jnp.sum(xf * xf, axis=1, keepdims=True), EPS))
    diss = (xf @ normed_y.T) / x_norm
    return jnp.maximum(diss, 0.0).reshape(B, K, 1, 1)


if __name__ == "__main__":
    key = jax.random.PRNGKey(0)
    kx, ky, kx2, ky2 = jax.random.split(key, 4)

    # Case 1: module-consistent shapes (H == h, W == w -> (B, K, 1, 1) output).
    B, C, H, W = 2, 4, 16, 16
    K = 9  # n_components (matches default filter_size[0])
    x = jax.random.normal(kx, (B, C, H, W), dtype=jnp.float32)
    y = jax.random.normal(ky, (K, C, H, W), dtype=jnp.float32)
    out = jax.block_until_ready(cosine_similarity_2d(x, y))
    ref = _reference(x, y)
    assert out.shape == (B, K, 1, 1)
    assert jnp.allclose(out, ref, atol=1e-4, rtol=1e-4), float(
        jnp.max(jnp.abs(out - ref)))

    # Case 2: ragged shapes (D not a multiple of 128, B not a multiple of the
    # sublane tile) -> exercises the unpadded-x in-kernel mask path.
    B2, C2, H2, W2, K2 = 10, 3, 7, 7, 5
    x_r = jax.random.normal(kx2, (B2, C2, H2, W2), dtype=jnp.float32)
    y_r = jax.random.normal(ky2, (K2, C2, H2, W2), dtype=jnp.float32)
    out_r = jax.block_until_ready(cosine_similarity_2d(x_r, y_r))
    ref_r = _reference(x_r, y_r)
    assert out_r.shape == (B2, K2, 1, 1)
    assert jnp.allclose(out_r, ref_r, atol=1e-4, rtol=1e-4), float(
        jnp.max(jnp.abs(out_r - ref_r)))

    print("KERNEL_OK")
</pallas_src>

<mosaic_0001>
module attributes {stable_mosaic.version = 11 : i64} {
  func.func @_cosine2d_kernel(%arg0: i32, %arg1: i32, %arg2: i32, %arg3: memref<8x1024xf32, #tpu.memory_space<vmem>>, %arg4: memref<128x1024xf32, #tpu.memory_space<vmem>>, %arg5: memref<1x128xf32, #tpu.memory_space<vmem>>, %arg6: memref<8x128xf32, #tpu.memory_space<vmem>>, %arg7: memref<8x128xf32, #tpu.memory_space<vmem>>, %arg8: memref<8x128xf32, #tpu.memory_space<vmem>>) attributes {dimension_semantics = [#tpu.dimension_semantics<parallel>, #tpu.dimension_semantics<parallel>, #tpu.dimension_semantics<arbitrary>], iteration_bounds = array<i64: 1, 1, 1>, scalar_prefetch = 0 : i64, scratch_operands = 2 : i64, tpu.core_type = #tpu.core_type<tc>, window_params = [{transform_indices = @transform_0, window_bounds = array<i64: 8, 1024>}, {pipeline_mode = #tpu.pipeline_mode<synchronous>, transform_indices = @transform_1, window_bounds = array<i64: 128, 1024>}, {transform_indices = @transform_2, window_bounds = array<i64: 1, 128>}, {transform_indices = @transform_3, window_bounds = array<i64: 8, 128>}]} {
    %c0_i32 = arith.constant 0 : i32
    %0 = arith.cmpi eq, %arg2, %c0_i32 : i32
    %1 = arith.extui %0 : i1 to i32
    %c0_i32_0 = arith.constant 0 : i32
    %2 = arith.cmpi ne, %1, %c0_i32_0 : i32
    scf.if %2 {
      %cst_12 = arith.constant 0.000000e+00 : f32
      %44 = vector.broadcast %cst_12 : f32 to vector<8x128xf32>
      %c0_13 = arith.constant 0 : index
      %c0_14 = arith.constant 0 : index
      %45 = vector.load %arg7[%c0_13, %c0_14] : memref<8x128xf32, #tpu.memory_space<vmem>>, vector<8x128xf32>
      tpu.vector_store %arg7[%c0_13, %c0_14], %44 {strides = array<i32>} : memref<8x128xf32, #tpu.memory_space<vmem>>, vector<8x128xf32>,
      %cst_15 = arith.constant 0.000000e+00 : f32
      %46 = vector.broadcast %cst_15 : f32 to vector<8x128xf32>
      %c0_16 = arith.constant 0 : index
      %c0_17 = arith.constant 0 : index
      %47 = vector.load %arg8[%c0_16, %c0_17] : memref<8x128xf32, #tpu.memory_space<vmem>>, vector<8x128xf32>
      tpu.vector_store %arg8[%c0_16, %c0_17], %46 {strides = array<i32>} : memref<8x128xf32, #tpu.memory_space<vmem>>, vector<8x128xf32>,
    } else {
    }
    %c0 = arith.constant 0 : index
    %c0_1 = arith.constant 0 : index
    %3 = vector.load %arg3[%c0, %c0_1] : memref<8x1024xf32, #tpu.memory_space<vmem>>, vector<8x1024xf32>
    %c128_i32 = arith.constant 128 : i32
    %4 = arith.muli %arg1, %c128_i32 : i32
    %5 = tpu.assume_multiple %4, 128 : i32
    %c1024_i32 = arith.constant 1024 : i32
    %6 = arith.muli %arg2, %c1024_i32 : i32
    %7 = tpu.assume_multiple %6, 1024 : i32
    %8 = arith.index_cast %5 : i32 to index
    %9 = arith.index_cast %7 : i32 to index
    %10 = vector.load %arg4[%8, %9] : memref<128x1024xf32, #tpu.memory_space<vmem>>, vector<128x1024xf32>
    %c0_2 = arith.constant 0 : index
    %c0_3 = arith.constant 0 : index
    %11 = vector.load %arg7[%c0_2, %c0_3] : memref<8x128xf32, #tpu.memory_space<vmem>>, vector<8x128xf32>
    %cst = arith.constant dense<0.000000e+00> : vector<8x128xf32>
    %12 = tpu.matmul %3, %10, %cst {dimension_numbers = #tpu.dot_dimension_numbers<[1], [1], [0], [0], [0, 0, 1, 0], [], []>} : vector<8x1024xf32>, vector<128x1024xf32>, vector<8x128xf32> -> vector<8x128xf32>
    %13 = arith.addf %11, %12 : vector<8x128xf32>
    %c0_4 = arith.constant 0 : index
    %c0_5 = arith.constant 0 : index
    %14 = vector.load %arg7[%c0_4, %c0_5] : memref<8x128xf32, #tpu.memory_space<vmem>>, vector<8x128xf32>
    tpu.vector_store %arg7[%c0_4, %c0_5], %13 {strides = array<i32>} : memref<8x128xf32, #tpu.memory_space<vmem>>, vector<8x128xf32>,
    %c0_6 = arith.constant 0 : index
    %c0_7 = arith.constant 0 : index
    %15 = vector.load %arg8[%c0_6, %c0_7] : memref<8x128xf32, #tpu.memory_space<vmem>>, vector<8x128xf32>
    %16 = vector.extract_strided_slice %3 {offsets = [0, 0], sizes = [8, 128], strides = [1, 1]} : vector<8x1024xf32> to vector<8x128xf32>
    %17 = arith.mulf %16, %16 : vector<8x128xf32>
    %18 = arith.addf %15, %17 : vector<8x128xf32>
    %19 = vector.extract_strided_slice %3 {offsets = [0, 128], sizes = [8, 128], strides = [1, 1]} : vector<8x1024xf32> to vector<8x128xf32>
    %20 = arith.mulf %19, %19 : vector<8x128xf32>
    %21 = arith.addf %18, %20 : vector<8x128xf32>
    %22 = vector.extract_strided_slice %3 {offsets = [0, 256], sizes = [8, 128], strides = [1, 1]} : vector<8x1024xf32> to vector<8x128xf32>
    %23 = arith.mulf %22, %22 : vector<8x128xf32>
    %24 = arith.addf %21, %23 : vector<8x128xf32>
    %25 = vector.extract_strided_slice %3 {offsets = [0, 384], sizes = [8, 128], strides = [1, 1]} : vector<8x1024xf32> to vector<8x128xf32>
    %26 = arith.mulf %25, %25 : vector<8x128xf32>
    %27 = arith.addf %24, %26 : vector<8x128xf32>
    %28 = vector.extract_strided_slice %3 {offsets = [0, 512], sizes = [8, 128], strides = [1, 1]} : vector<8x1024xf32> to vector<8x128xf32>
    %29 = arith.mulf %28, %28 : vector<8x128xf32>
    %30 = arith.addf %27, %29 : vector<8x128xf32>
    %31 = vector.extract_strided_slice %3 {offsets = [0, 640], sizes = [8, 128], strides = [1, 1]} : vector<8x1024xf32> to vector<8x128xf32>
    %32 = arith.mulf %31, %31 : vector<8x128xf32>
    %33 = arith.addf %30, %32 : vector<8x128xf32>
    %34 = vector.extract_strided_slice %3 {offsets = [0, 768], sizes = [8, 128], strides = [1, 1]} : vector<8x1024xf32> to vector<8x128xf32>
    %35 = arith.mulf %34, %34 : vector<8x128xf32>
    %36 = arith.addf %33, %35 : vector<8x128xf32>
    %37 = vector.extract_strided_slice %3 {offsets = [0, 896], sizes = [8, 128], strides = [1, 1]} : vector<8x1024xf32> to vector<8x128xf32>
    %38 = arith.mulf %37, %37 : vector<8x128xf32>
    %39 = arith.addf %36, %38 : vector<8x128xf32>
    %c0_8 = arith.constant 0 : index
    %c0_9 = arith.constant 0 : index
    %40 = vector.load %arg8[%c0_8, %c0_9] : memref<8x128xf32, #tpu.memory_space<vmem>>, vector<8x128xf32>
    tpu.vector_store %arg8[%c0_8, %c0_9], %39 {strides = array<i32>} : memref<8x128xf32, #tpu.memory_space<vmem>>, vector<8x128xf32>,
    %c0_i32_10 = arith.constant 0 : i32
    %41 = arith.cmpi eq, %arg2, %c0_i32_10 : i32
    %42 = arith.extui %41 : i1 to i32
    %c0_i32_11 = arith.constant 0 : i32
    %43 = arith.cmpi ne, %42, %c0_i32_11 : i32
    scf.if %43 {
      %c0_12 = arith.constant 0 : index
      %c0_13 = arith.constant 0 : index
      %44 = vector.load %arg8[%c0_12, %c0_13] : memref<8x128xf32, #tpu.memory_space<vmem>>, vector<8x128xf32>
      %cst_14 = arith.constant dense<0.000000e+00> : vector<8xf32>
      %45 = vector.multi_reduction <add>, %44, %cst_14 [1] : vector<8x128xf32> to vector<8xf32>
      %46 = vector.shape_cast %45 : vector<8xf32> to vector<8x1xf32>
      %cst_15 = arith.constant 9.99999993E-9 : f32
      %47 = vector.broadcast %cst_15 : f32 to vector<8x1xf32>
      %48 = arith.maximumf %46, %47 : vector<8x1xf32>
      %49 = math.rsqrt %48 : vector<8x1xf32>
      %c0_16 = arith.constant 0 : index
      %c0_17 = arith.constant 0 : index
      %50 = vector.load %arg7[%c0_16, %c0_17] : memref<8x128xf32, #tpu.memory_space<vmem>>, vector<8x128xf32>
      %c0_18 = arith.constant 0 : index
      %c0_19 = arith.constant 0 : index
      %51 = vector.load %arg5[%c0_18, %c0_19] : memref<1x128xf32, #tpu.memory_space<vmem>>, vector<1x128xf32>
      %52 = vector.broadcast %51 : vector<1x128xf32> to vector<8x128xf32>
      %53 = arith.mulf %50, %52 : vector<8x128xf32>
      %54 = vector.broadcast %49 : vector<8x1xf32> to vector<8x128xf32>
      %55 = arith.mulf %53, %54 : vector<8x128xf32>
      %cst_20 = arith.constant 0.000000e+00 : f32
      %56 = vector.broadcast %cst_20 : f32 to vector<8x128xf32>
      %57 = arith.maximumf %55, %56 : vector<8x128xf32>
      %c0_21 = arith.constant 0 : index
      %c0_22 = arith.constant 0 : index
      %58 = vector.load %arg6[%c0_21, %c0_22] : memref<8x128xf32, #tpu.memory_space<vmem>>, vector<8x128xf32>
      tpu.vector_store %arg6[%c0_21, %c0_22], %57 {strides = array<i32>} : memref<8x128xf32, #tpu.memory_space<vmem>>, vector<8x128xf32>,
    } else {
    }
    return
  }
  func.func @transform_0(%arg0: i32, %arg1: i32, %arg2: i32) -> (i32, i32) {
    %c0_i32 = arith.constant 0 : i32
    return %arg0, %arg2 : i32, i32
  }
  func.func @transform_1(%arg0: i32, %arg1: i32, %arg2: i32) -> (i32, i32) {
    %c0_i32 = arith.constant 0 : i32
    %c0_i32_0 = arith.constant 0 : i32
    %c0_i32_1 = arith.constant 0 : i32
    return %c0_i32, %c0_i32_0 : i32, i32
  }
  func.func @transform_2(%arg0: i32, %arg1: i32, %arg2: i32) -> (i32, i32) {
    %c0_i32 = arith.constant 0 : i32
    %c0_i32_0 = arith.constant 0 : i32
    return %c0_i32, %arg1 : i32, i32
  }
  func.func @transform_3(%arg0: i32, %arg1: i32, %arg2: i32) -> (i32, i32) {
    %c0_i32 = arith.constant 0 : i32
    return %arg0, %arg1 : i32, i32
  }
}

</mosaic_0001>

<bundles_post_ra>
// kernel: tpu_custom_call.1
= control target key start
LH: loop header
LB: loop body
LE: loop exit
PB: predicated region body
PF: predicated region fallthrough
CT: control target
= control target key end

     0   :  { %8 = vsyncpa [#allocation5], 0  ;;  %s1133_s0 = inlined_call_operand.hbm [shape: f32[2,1024], index: 0, kind: input, shape index: {}]   ;;  %s1134_s1 = inlined_call_operand.hbm [shape: f32[128,1024], index: 1, kind: input, shape index: {}]   ;;  %s1135_s2 = inlined_call_operand.vmem [shape: f32[1,128], index: 2, kind: input, shape index: {}]   ;;  %s1136_s3 = inlined_call_operand.hbm [shape: f32[2,128], index: 3, kind: output, shape index: {}]  }
   0x1   :  { %9 = vsyncpa [#allocation8], 0 }
   0x2   :  { %10 = vsyncpa [#allocation6], 0 }
   0x3   :  { %15 = vsyncadd [#allocation5], 768  ;;  %s961_s12 = smov [#allocation4]  }
   0x4   :  { %s16_s13 = sshll.u32 %s961_s12, 4  ;;  %s17_s13 = int_to_ptr.vmem [resolvable:$true] %s16_s13 }
   0x5   :  { %s903_s14 = scalar_lea.vmem %s17_s13, 256  ;;  %s907_s15 = scalar_lea.vmem %s17_s13, 1024 }
   0x6   :  { %p904_p0 = scmp.ne.s32.totalorder %s17_s13, %s903_s14  ;;  %p908_p1 = scmp.lt.s32.totalorder %s17_s13, %s17_s13 }
   0x7   :  { %p909_p2 = scmp.lt.s32.totalorder %s907_s15, %s903_s14 }
   0x9   :  { %p910_p3 = por %p909_p2, %p908_p1 }
   0xb   :  { %p911_p4 = pnand %p910_p3, %p904_p0 }
   0xd   :  { %914 = shalt.err (!%p911_p4)
}
   0xe   :  { %s962_s16 = smov 256   ;;  %s963_s17 = smov 16  }
   0xf   :  { %22 = dma.hbm_to_vmem [thread:$0]  %s1133_s0, 256, %s17_s13, [#allocation5], %s962_s16, %s962_s16, %s963_s17  }
  0x10   :  { %s964_s20 = smov [#allocation7]  }
  0x11   :  { %s28_s21 = sshll.u32 %s964_s20, 4  ;;  %s29_s21 = int_to_ptr.vmem [resolvable:$true] %s28_s21 }
  0x12   :  { %s923_s22 = scalar_lea.vmem %s29_s21, 16384  ;;  %p928_p6 = scmp.lt.s32.totalorder %s29_s21, %s29_s21 }
  0x13   :  { %p924_p5 = scmp.ne.s32.totalorder %s29_s21, %s923_s22  ;;  %p929_p7 = scmp.lt.s32.totalorder %s923_s22, %s923_s22 }
  0x15   :  { %p930_p8 = por %p929_p7, %p928_p6 }
  0x17   :  { %p931_p9 = pnand %p930_p8, %p924_p5 }
  0x19   :  { %934 = shalt.err (!%p931_p9)
}
  0x1a   :  { %s965_s23 = smov 1024   ;;  %s966_s24 = smov 64  }
  0x1b   :  { %34 = dma.hbm_to_vmem [thread:$0]  %s1134_s1, 16384, %s29_s21, [#allocation8], %s965_s23, %s965_s23, %s966_s24  }
  0x1c   :  { %955 = dma.done.wait [#allocation5], 1024  }
  0x1d   :  { %956 = vsyncadd [#allocation5], 4294966272 }
  0x1e   :  { %957 = dma.done.wait [#allocation8], 16384  }
  0x1f   :  { %958 = vsyncadd [#allocation8], 4294950912  ;;  %v188_v0 = vld [vmem:[#allocation7 + $0x3c8] sm:$0xff]  ;;  %v190_v1 = vld [vmem:[#allocation7 + $0x3d8] sm:$0xff]  ;;  %v967_v18 = vmov 1983009808   ;;  %v211_v20 = vlaneseq }
  0x20   :  { %v187_v2 = vld [vmem:[#allocation7 + $0x3c0] sm:$0xff]  ;;  %284 = vmatprep.subr.mxu0 %v188_v0  ;;  %354 = vmatprep.subr.mxu1 %v190_v1  ;;  %v189_v3 = vld [vmem:[#allocation7 + $0x3d0] sm:$0xff]  ;;  %v180_v4 = vld [vmem:[#allocation7 + $0x388] sm:$0xff]  ;;  %v209_v19 = vunpack.c.l.s4 %v967_v18 }
  0x21   :  { %v182_v5 = vld [vmem:[#allocation7 + $0x398] sm:$0xff]  ;;  %285 = vmatpush1.xpose.msra.mxu0 %v187_v2  ;;  %355 = vmatpush1.xpose.msra.mxu1 %v189_v3  ;;  %v179_v6 = vld [vmem:[#allocation7 + $0x380] sm:$0xff]  ;;  %v181_v7 = vld [vmem:[#allocation7 + $0x390] sm:$0xff]  ;;  %v212_v26 = vshrl.u32 %v211_v20, 7 }
  0x22   :  { %286 = vmatprep.subr.mxu0 %v180_v4  ;;  %356 = vmatprep.subr.mxu1 %v182_v5  ;;  %v172_v8 = vld [vmem:[#allocation7 + $0x348] sm:$0xff]  ;;  %v174_v9 = vld [vmem:[#allocation7 + $0x358] sm:$0xff]  ;;  %v171_v10 = vld [vmem:[#allocation7 + $0x340] sm:$0xff]  ;;  %v210_v25 = vunpack.c.0.s8 %v209_v19 }
  0x23   :  { %v173_v11 = vld [vmem:[#allocation7 + $0x350] sm:$0xff]  ;;  %v164_v12 = vld [vmem:[#allocation7 + $0x308] sm:$0xff]  ;;  %v166_v13 = vld [vmem:[#allocation7 + $0x318] sm:$0xff] }
  0x24   :  { %v163_v14 = vld [vmem:[#allocation7 + $0x300] sm:$0xff]  ;;  %v165_v15 = vld [vmem:[#allocation7 + $0x310] sm:$0xff]  ;;  %v156_v16 = vld [vmem:[#allocation7 + $0x2c8] sm:$0xff]  ;;  %v997_v31 = vsub.s32 %v210_v25, %v212_v26 }
  0x25   :  { %287 = vmatpush1.xpose.msra.mxu0 %v179_v6  ;;  %357 = vmatpush1.xpose.msra.mxu1 %v181_v7  ;;  %v158_v17 = vld [vmem:[#allocation7 + $0x2d8] sm:$0xff]  ;;  %v155_v21 = vld [vmem:[#allocation7 + $0x2c0] sm:$0xff]  ;;  %v157_v22 = vld [vmem:[#allocation7 + $0x2d0] sm:$0xff] }
  0x26   :  { %288 = vmatprep.subr.mxu0 %v172_v8  ;;  %358 = vmatprep.subr.mxu1 %v174_v9  ;;  %v148_v23 = vld [vmem:[#allocation7 + $0x288] sm:$0xff]  ;;  %v150_v24 = vld [vmem:[#allocation7 + $0x298] sm:$0xff]  ;;  %v147_v27 = vld [vmem:[#allocation7 + $0x280] sm:$0xff] }
  0x27   :  { %v149_v28 = vld [vmem:[#allocation7 + $0x290] sm:$0xff]  ;;  %v140_v29 = vld [vmem:[#allocation7 + $0x248] sm:$0xff]  ;;  %v142_v30 = vld [vmem:[#allocation7 + $0x258] sm:$0xff] }
  0x28   :  { %v999_v32 = vld [vmem:[#allocation4] sm:$0xff]  ;;  %v1001_v33 = vld [vmem:[#allocation4 + $0x10] sm:$0xff]  ;;  %v132_v46 = vld [vmem:[#allocation7 + $0x208] sm:$0xff] }
  0x29   :  { %289 = vmatpush1.xpose.msra.mxu0 %v171_v10  ;;  %359 = vmatpush1.xpose.msra.mxu1 %v173_v11  ;;  %v1003_v34 = vld [vmem:[#allocation4 + $0x20] sm:$0xff]  ;;  %v1005_v35 = vld [vmem:[#allocation4 + $0x30] sm:$0xff]  ;;  %v204_v36 = vcombine.low %v999_v32, %v1001_v33  ;;  %v205_v37 = vcombine.high %v999_v32, %v1001_v33  ;;  %v567_v38 = vmul.f32 %v999_v32, %v999_v32  ;;  %v594_v39 = vrot.slane %v999_v32, 2  ;;  %v134_v47 = vld [vmem:[#allocation7 + $0x218] sm:$0xff] }
  0x2a   :  { %290 = vmatprep.subr.mxu0 %v164_v12  ;;  %360 = vmatprep.subr.mxu1 %v166_v13  ;;  %v139_v40 = vld [vmem:[#allocation7 + $0x240] sm:$0xff]  ;;  %v141_v41 = vld [vmem:[#allocation7 + $0x250] sm:$0xff]  ;;  %v206_v42 = vcombine.low %v1003_v34, %v1005_v35  ;;  %v207_v43 = vcombine.high %v1003_v34, %v1005_v35  ;;  %v568_v44 = vmul.f32 %v1001_v33, %v1001_v33  ;;  %v595_v45 = vrot.slane %v1001_v33, 2  ;;  %v124_v1 = vld [vmem:[#allocation7 + $0x1c8] sm:$0xff] }
  0x2b   :  { %v1022_v48 = vrot.slane %v204_v36, %v997_v31  ;;  %v1025_v49 = vrot.slane %v205_v37, %v997_v31  ;;  %v569_v50 = vmul.f32 %v1003_v34, %v1003_v34  ;;  %v570_v51 = vmul.f32 %v1005_v35, %v1005_v35  ;;  %v131_v60 = vld [vmem:[#allocation7 + $0x200] sm:$0xff]  ;;  %v133_v61 = vld [vmem:[#allocation7 + $0x210] sm:$0xff]  ;;  %v126_v2 = vld [vmem:[#allocation7 + $0x1d8] sm:$0xff] }
  0x2c   :  { %v1032_v52 = vrot.slane %v206_v42, %v997_v31  ;;  %v1035_v53 = vrot.slane %v207_v43, %v997_v31  ;;  %v575_v54 = vcombine.low %v567_v38, %v568_v44  ;;  %v596_v55 = vrot.slane %v1003_v34, 2  ;;  %v123_v13 = vld [vmem:[#allocation7 + $0x1c0] sm:$0xff]  ;;  %v116_v19 = vld [vmem:[#allocation7 + $0x188] sm:$0xff]  ;;  %v118_v20 = vld [vmem:[#allocation7 + $0x198] sm:$0xff] }
  0x2d   :  { %291 = vmatpush1.xpose.msra.mxu0 %v163_v14  ;;  %361 = vmatpush1.xpose.msra.mxu1 %v165_v15  ;;  %v576_v56 = vcombine.low %v569_v50, %v570_v51  ;;  %v597_v57 = vrot.slane %v1005_v35, 2  ;;  %v602_v58 = vmul.f32 %v594_v39, %v594_v39  ;;  %v603_v59 = vmul.f32 %v595_v45, %v595_v45  ;;  %v125_v14 = vld [vmem:[#allocation7 + $0x1d0] sm:$0xff]  ;;  %v108_v39 = vld [vmem:[#allocation7 + $0x148] sm:$0xff]  ;;  %v107_v43 = vld [vmem:[#allocation7 + $0x140] sm:$0xff] }
  0x2e   :  { %292 = vmatprep.subr.mxu0 %v156_v16  ;;  %362 = vmatprep.subr.mxu1 %v158_v17  ;;  %v237_v62 = vcombine.high %v1022_v48, %v1032_v52  ;;  %v239_v63 = vcombine.high %v1025_v49, %v1035_v53  ;;  %v629_v0 = vrot.slane %v999_v32, 4  ;;  %v583_v3 = vrot.slane %v575_v54, %v997_v31  ;;  %v117_v36 = vld [vmem:[#allocation7 + $0x190] sm:$0xff]  ;;  %v100_v45 = vld [vmem:[#allocation7 + $0x108] sm:$0xff] }
  0x2f   :  { %v604_v4 = vmul.f32 %v596_v55, %v596_v55  ;;  %v605_v5 = vmul.f32 %v597_v57, %v597_v57  ;;  %v610_v6 = vcombine.low %v602_v58, %v603_v59  ;;  %v630_v7 = vrot.slane %v1001_v33, 4  ;;  %v109_v44 = vld [vmem:[#allocation7 + $0x150] sm:$0xff]  ;;  %v99_v55 = vld [vmem:[#allocation7 + $0x100] sm:$0xff]  ;;  %v92_v57 = vld [vmem:[#allocation7 + $0xc8] sm:$0xff] }
  0x30   :  { %348 = vmatprep.mubr.f32.mxu0 %v237_v62  ;;  %418 = vmatprep.mubr.f32.mxu1 %v239_v63  ;;  %v631_v8 = vrot.slane %v1003_v34, 4  ;;  %v590_v9 = vrot.slane %v576_v56, %v997_v31  ;;  %v632_v10 = vrot.slane %v1005_v35, 4  ;;  %v637_v11 = vmul.f32 %v629_v0, %v629_v0  ;;  %v101_v56 = vld [vmem:[#allocation7 + $0x110] sm:$0xff]  ;;  %v94_v58 = vld [vmem:[#allocation7 + $0xd8] sm:$0xff]  ;;  %v1059_v59 = vld [vmem:[#allocation4 + $0x8] sm:$0xff] }
  0x31   :  { %293 = vmatpush1.xpose.msra.mxu0 %v155_v21  ;;  %363 = vmatpush1.xpose.msra.mxu1 %v157_v22  ;;  %v664_v12 = vrot.slane %v999_v32, 6  ;;  %v611_v15 = vcombine.low %v604_v4, %v605_v5  ;;  %v618_v16 = vrot.slane %v610_v6, %v997_v31  ;;  %v638_v17 = vmul.f32 %v630_v7, %v630_v7  ;;  %v1063_v63 = vld [vmem:[#allocation4 + $0x28] sm:$0xff]  ;;  %v91_v5 = vld [vmem:[#allocation7 + $0xc0] sm:$0xff]  ;;  %v93_v6 = vld [vmem:[#allocation7 + $0xd0] sm:$0xff] }
  0x32   :  { %294 = vmatprep.subr.mxu0 %v148_v23  ;;  %364 = vmatprep.subr.mxu1 %v150_v24  ;;  %v665_v18 = vrot.slane %v1001_v33, 6  ;;  %v639_v21 = vmul.f32 %v631_v8, %v631_v8  ;;  %v640_v22 = vmul.f32 %v632_v10, %v632_v10  ;;  %v666_v23 = vrot.slane %v1003_v34, 6  ;;  %v115_v33 = vld [vmem:[#allocation7 + $0x180] sm:$0xff]  ;;  %v110_v34 = vld [vmem:[#allocation7 + $0x158] sm:$0xff] }
  0x33   :  { %v667_v24 = vrot.slane %v1005_v35, 6  ;;  %v625_v25 = vrot.slane %v611_v15, %v997_v31  ;;  %v645_v26 = vcombine.low %v637_v11, %v638_v17  ;;  %v591_v37 = vcombine.low %v583_v3, %v590_v9  ;;  %v84_v9 = vld [vmem:[#allocation7 + $0x88] sm:$0xff]  ;;  %v86_v10 = vld [vmem:[#allocation7 + $0x98] sm:$0xff] }
  0x34   :  { %v699_v0 = vmul.f32 %v1059_v59, %v1059_v59  ;;  %v701_v3 = vmul.f32 %v1063_v63, %v1063_v63  ;;  %v726_v4 = vrot.slane %v1059_v59, 2 }
  0x35   :  { %295 = vmatpush1.xpose.msra.mxu0 %v147_v27  ;;  %365 = vmatpush1.xpose.msra.mxu1 %v149_v28  ;;  %v672_v27 = vmul.f32 %v664_v12, %v664_v12  ;;  %v673_v28 = vmul.f32 %v665_v18, %v665_v18  ;;  %v675_v32 = vmul.f32 %v667_v24, %v667_v24 }
  0x36   :  { %296 = vmatprep.subr.mxu0 %v140_v29  ;;  %366 = vmatprep.subr.mxu1 %v142_v30  ;;  %v646_v29 = vcombine.low %v639_v21, %v640_v22  ;;  %v674_v30 = vmul.f32 %v666_v23, %v666_v23  ;;  %v626_v38 = vcombine.low %v618_v16, %v625_v25  ;;  %v761_v21 = vrot.slane %v1059_v59, 4  ;;  %v83_v22 = vld [vmem:[#allocation7 + $0x80] sm:$0xff]  ;;  %v85_v23 = vld [vmem:[#allocation7 + $0x90] sm:$0xff] }
  0x37   :  { %v653_v35 = vrot.slane %v645_v26, %v997_v31  ;;  %v734_v16 = vmul.f32 %v726_v4, %v726_v4  ;;  %v67_v4 = vld [vmem:[#allocation7] sm:$0xff] }
  0x38   :  { %v681_v42 = vcombine.low %v674_v30, %v675_v32 }
  0x39   :  { %297 = vmatpush1.xpose.msra.mxu0 %v139_v40  ;;  %367 = vmatpush1.xpose.msra.mxu1 %v141_v41  ;;  %v660_v40 = vrot.slane %v646_v29, %v997_v31  ;;  %v680_v41 = vcombine.low %v672_v27, %v673_v28  ;;  %v76_v28 = vld [vmem:[#allocation7 + $0x48] sm:$0xff]  ;;  %v78_v29 = vld [vmem:[#allocation7 + $0x58] sm:$0xff] }
  0x3a   :  { %298 = vmatprep.subr.mxu0 %v132_v46  ;;  %368 = vmatprep.subr.mxu1 %v134_v47  ;;  %v102_v46 = vld [vmem:[#allocation7 + $0x118] sm:$0xff]  ;;  %v628_v47 = vadd.f32 %v626_v38, %v591_v37  ;;  %v695_v54 = vrot.slane %v681_v42, %v997_v31  ;;  %v796_v42 = vrot.slane %v1059_v59, 6 }
  0x3b   :  { %v661_v50 = vcombine.low %v653_v35, %v660_v40  ;;  %v688_v51 = vrot.slane %v680_v41, %v997_v31 }
  0x3d   :  { %299 = vmatpush1.xpose.msra.mxu0 %v131_v60  ;;  %369 = vmatpush1.xpose.msra.mxu1 %v133_v61  ;;  %v1061_v60 = vld [vmem:[#allocation4 + $0x18] sm:$0xff]  ;;  %v663_v61 = vadd.f32 %v661_v50, %v628_v47  ;;  %v696_v62 = vcombine.low %v688_v51, %v695_v54  ;;  %v68_v51 = vld [vmem:[#allocation7 + $0x8] sm:$0xff] }
  0x3e   :  { %300 = vmatprep.subr.mxu0 %v124_v1  ;;  %370 = vmatprep.subr.mxu1 %v126_v2  ;;  %v700_v1 = vmul.f32 %v1061_v60, %v1061_v60  ;;  %v1069_v2 = vld [vmem:[#allocation4 + $0x38] sm:$0xff]  ;;  %v727_v8 = vrot.slane %v1061_v60, 2  ;;  %v240_v18 = vcombine.low %v1059_v59, %v1061_v60  ;;  %v762_v27 = vrot.slane %v1061_v60, 4 }
  0x3f   :  { %v702_v7 = vmul.f32 %v1069_v2, %v1069_v2  ;;  %v698_v11 = vadd.f32 %v696_v62, %v663_v61  ;;  %v729_v15 = vrot.slane %v1069_v2, 2  ;;  %v243_v24 = vcombine.high %v1063_v63, %v1069_v2  ;;  %v70_v54 = vld [vmem:[#allocation7 + $0x18] sm:$0xff] }
  0x40   :  { %v707_v12 = vcombine.low %v699_v0, %v700_v1  ;;  %v735_v17 = vmul.f32 %v727_v8, %v727_v8  ;;  %v764_v38 = vrot.slane %v1069_v2, 4  ;;  %v797_v50 = vrot.slane %v1061_v60, 6  ;;  %v194_v8 = vld [vmem:[#allocation7 + $0x3f8] sm:$0xff] }
  0x41   :  { %301 = vmatpush1.xpose.msra.mxu0 %v123_v13  ;;  %371 = vmatpush1.xpose.msra.mxu1 %v125_v14  ;;  %v728_v13 = vrot.slane %v1063_v63, 2  ;;  %v708_v14 = vcombine.low %v701_v3, %v702_v7  ;;  %v737_v32 = vmul.f32 %v729_v15, %v729_v15  ;;  %v192_v7 = vld [vmem:[#allocation7 + $0x3e8] sm:$0xff] }
  0x42   :  { %302 = vmatprep.subr.mxu0 %v116_v19  ;;  %372 = vmatprep.subr.mxu1 %v118_v20  ;;  %v242_v19 = vcombine.low %v1063_v63, %v1069_v2  ;;  %v241_v20 = vcombine.high %v1059_v59, %v1061_v60  ;;  %v715_v25 = vrot.slane %v707_v12, %v997_v31 }
  0x43   :  { %v722_v26 = vrot.slane %v708_v14, %v997_v31  ;;  %v736_v30 = vmul.f32 %v728_v13, %v728_v13  ;;  %v1100_v59 = vrot.slane %v240_v18, %v997_v31  ;;  %v805_v0 = vmul.f32 %v797_v50, %v797_v50  ;;  %v191_v18 = vld [vmem:[#allocation7 + $0x3e0] sm:$0xff]  ;;  %v137_v50 = vld [vmem:[#allocation7 + $0x230] sm:$0xff] }
  0x44   :  { %v236_v13 = vcombine.low %v1022_v48, %v1032_v52  ;;  %v238_v14 = vcombine.low %v1025_v49, %v1035_v53 }
  0x45   :  { %303 = vmatpush1.xpose.msra.mxu0 %v115_v33  ;;  %373 = vmatpush1.xpose.msra.mxu1 %v117_v36  ;;  %v742_v33 = vcombine.low %v734_v16, %v735_v17  ;;  %v763_v36 = vrot.slane %v1063_v63, 4  ;;  %v723_v37 = vcombine.low %v715_v25, %v722_v26  ;;  %v743_v35 = vcombine.low %v736_v30, %v737_v32  ;;  %v178_v25 = vld [vmem:[#allocation7 + $0x378] sm:$0xff]  ;;  %v175_v26 = vld [vmem:[#allocation7 + $0x360] sm:$0xff]  ;;  %v169_v32 = vld [vmem:[#allocation7 + $0x330] sm:$0xff] }
  0x46   :  { %304 = vmatprep.subr.mxu0 %v108_v39  ;;  %374 = vmatprep.subr.mxu1 %v110_v34  ;;  %v769_v39 = vmul.f32 %v761_v21, %v761_v21  ;;  %v770_v34 = vmul.f32 %v762_v27, %v762_v27  ;;  %v184_v21 = vld [vmem:[#allocation7 + $0x3a8] sm:$0xff]  ;;  %v177_v27 = vld [vmem:[#allocation7 + $0x370] sm:$0xff]  ;;  %v167_v30 = vld [vmem:[#allocation7 + $0x320] sm:$0xff] }
  0x47   :  { %v750_v40 = vrot.slane %v742_v33, %v997_v31  ;;  %v771_v41 = vmul.f32 %v763_v36, %v763_v36  ;;  %v160_v33 = vld [vmem:[#allocation7 + $0x2e8] sm:$0xff]  ;;  %v162_v36 = vld [vmem:[#allocation7 + $0x2f8] sm:$0xff] }
  0x48   :  { %v777_v47 = vcombine.low %v769_v39, %v770_v34  ;;  %v152_v39 = vld [vmem:[#allocation7 + $0x2a8] sm:$0xff]  ;;  %v154_v34 = vld [vmem:[#allocation7 + $0x2b8] sm:$0xff] }
  0x49   :  { %305 = vmatpush1.xpose.msra.mxu0 %v107_v43  ;;  %375 = vmatpush1.xpose.msra.mxu1 %v109_v44  ;;  %v75_v43 = vld [vmem:[#allocation7 + $0x40] sm:$0xff]  ;;  %v77_v44 = vld [vmem:[#allocation7 + $0x50] sm:$0xff] }
  0x4a   :  { %306 = vmatprep.subr.mxu0 %v100_v45  ;;  %376 = vmatprep.subr.mxu1 %v102_v46  ;;  %v725_v45 = vadd.f32 %v723_v37, %v698_v11  ;;  %v772_v46 = vmul.f32 %v764_v38, %v764_v38  ;;  %v785_v62 = vrot.slane %v777_v47, %v997_v31  ;;  %v159_v37 = vld [vmem:[#allocation7 + $0x2e0] sm:$0xff]  ;;  %v161_v38 = vld [vmem:[#allocation7 + $0x2f0] sm:$0xff] }
  0x4b   :  { %v135_v47 = vld [vmem:[#allocation7 + $0x220] sm:$0xff] }
  0x4c   :  { %v778_v61 = vcombine.low %v771_v41, %v772_v46  ;;  %v144_v41 = vld [vmem:[#allocation7 + $0x268] sm:$0xff]  ;;  %v138_v46 = vld [vmem:[#allocation7 + $0x238] sm:$0xff] }
  0x4d   :  { %307 = vmatpush1.xpose.msra.mxu0 %v99_v55  ;;  %377 = vmatpush1.xpose.msra.mxu1 %v101_v56  ;;  %v757_v55 = vrot.slane %v743_v35, %v997_v31  ;;  %v798_v56 = vrot.slane %v1063_v63, 6  ;;  %v1104_v63 = vrot.slane %v241_v20, %v997_v31  ;;  %v151_v35 = vld [vmem:[#allocation7 + $0x2a0] sm:$0xff] }
  0x4e   :  { %308 = vmatprep.subr.mxu0 %v92_v57  ;;  %378 = vmatprep.subr.mxu1 %v94_v58  ;;  %v799_v57 = vrot.slane %v1069_v2, 6  ;;  %v804_v58 = vmul.f32 %v796_v42, %v796_v42  ;;  %v792_v2 = vrot.slane %v778_v61, %v997_v31  ;;  %v146_v42 = vld [vmem:[#allocation7 + $0x278] sm:$0xff]  ;;  %v119_v61 = vld [vmem:[#allocation7 + $0x1a0] sm:$0xff] }
  0x4f   :  { %v758_v1 = vcombine.low %v750_v40, %v757_v55  ;;  %v806_v60 = vmul.f32 %v798_v56, %v798_v56  ;;  %v153_v40 = vld [vmem:[#allocation7 + $0x2b0] sm:$0xff]  ;;  %v127_v55 = vld [vmem:[#allocation7 + $0x1e0] sm:$0xff] }
  0x50   :  { %v807_v3 = vmul.f32 %v799_v57, %v799_v57  ;;  %v793_v15 = vcombine.low %v785_v62, %v792_v2  ;;  %v129_v56 = vld [vmem:[#allocation7 + $0x1f0] sm:$0xff]  ;;  %v120_v57 = vld [vmem:[#allocation7 + $0x1a8] sm:$0xff]  ;;  %v103_v2 = vld [vmem:[#allocation7 + $0x120] sm:$0xff] }
  0x51   :  { %309 = vmatpush1.xpose.msra.mxu0 %v91_v5  ;;  %379 = vmatpush1.xpose.msra.mxu1 %v93_v6  ;;  %v69_v5 = vld [vmem:[#allocation7 + $0x10] sm:$0xff]  ;;  %v812_v6 = vcombine.low %v804_v58, %v805_v0  ;;  %v760_v11 = vadd.f32 %v758_v1, %v725_v45  ;;  %v136_v45 = vld [vmem:[#allocation7 + $0x228] sm:$0xff]  ;;  %v122_v58 = vld [vmem:[#allocation7 + $0x1b8] sm:$0xff] }
  0x52   :  { %310 = vmatprep.subr.mxu0 %v84_v9  ;;  %380 = vmatprep.subr.mxu1 %v86_v10  ;;  %v1108_v9 = vrot.slane %v242_v19, %v997_v31  ;;  %v1111_v10 = vrot.slane %v243_v24, %v997_v31  ;;  %v813_v12 = vcombine.low %v806_v60, %v807_v3  ;;  %v193_v19 = vld [vmem:[#allocation7 + $0x3f0] sm:$0xff]  ;;  %v176_v24 = vld [vmem:[#allocation7 + $0x368] sm:$0xff]  ;;  %v114_v1 = vld [vmem:[#allocation7 + $0x178] sm:$0xff] }
  0x53   :  { %v820_v16 = vrot.slane %v812_v6, %v997_v31  ;;  %v795_v20 = vadd.f32 %v793_v15, %v760_v11  ;;  %v121_v62 = vld [vmem:[#allocation7 + $0x1b0] sm:$0xff]  ;;  %v112_v0 = vld [vmem:[#allocation7 + $0x168] sm:$0xff]  ;;  %v111_v60 = vld [vmem:[#allocation7 + $0x160] sm:$0xff] }
  0x54   :  { %v827_v17 = vrot.slane %v813_v12, %v997_v31  ;;  %v273_v48 = vcombine.high %v1100_v59, %v1108_v9  ;;  %v275_v49 = vcombine.high %v1104_v63, %v1111_v10  ;;  %v183_v31 = vld [vmem:[#allocation7 + $0x3a0] sm:$0xff]  ;;  %v113_v3 = vld [vmem:[#allocation7 + $0x170] sm:$0xff] }
  0x55   :  { %311 = vmatpush1.xpose.msra.mxu0 %v83_v22  ;;  %381 = vmatpush1.xpose.msra.mxu1 %v85_v23  ;;  %v186_v22 = vld [vmem:[#allocation7 + $0x3b8] sm:$0xff]  ;;  %v185_v23 = vld [vmem:[#allocation7 + $0x3b0] sm:$0xff]  ;;  %v95_v11 = vld [vmem:[#allocation7 + $0xe0] sm:$0xff] }
  0x56   :  { %312 = vmatprep.subr.mxu0 %v76_v28  ;;  %382 = vmatprep.subr.mxu1 %v78_v29  ;;  %v828_v52 = vcombine.low %v820_v16, %v827_v17  ;;  %v168_v28 = vld [vmem:[#allocation7 + $0x328] sm:$0xff]  ;;  %v170_v29 = vld [vmem:[#allocation7 + $0x338] sm:$0xff]  ;;  %v105_v6 = vld [vmem:[#allocation7 + $0x130] sm:$0xff] }
  0x57   :  { %v97_v12 = vld [vmem:[#allocation7 + $0xf0] sm:$0xff]  ;;  %v87_v15 = vld [vmem:[#allocation7 + $0xa0] sm:$0xff]  ;;  %v80_v17 = vld [vmem:[#allocation7 + $0x68] sm:$0xff] }
  0x58   :  { %v830_v53 = vadd.f32 %v828_v52, %v795_v20  ;;  %v89_v16 = vld [vmem:[#allocation7 + $0xb0] sm:$0xff]  ;;  %v272_v52 = vcombine.low %v1100_v59, %v1108_v9  ;;  %v874_v59 = vld [vmem:[%s1135_s2] ss:$0 sm:$0xff] }
  0x59   :  { %313 = vmatpush1.xpose.msra.mxu0 %v75_v43  ;;  %383 = vmatpush1.xpose.msra.mxu1 %v77_v44  ;;  %v143_v43 = vld [vmem:[#allocation7 + $0x260] sm:$0xff]  ;;  %v145_v44 = vld [vmem:[#allocation7 + $0x270] sm:$0xff] }
  0x5a   :  { %314 = vmatprep.subr.mxu0 %v68_v51  ;;  %384 = vmatprep.subr.mxu1 %v70_v54  ;;  %v128_v51 = vld [vmem:[#allocation7 + $0x1e8] sm:$0xff]  ;;  %v130_v54 = vld [vmem:[#allocation7 + $0x1f8] sm:$0xff]  ;;  %v81_v20 = vld [vmem:[#allocation7 + $0x70] sm:$0xff] }
  0x5b   :  { %836 = vadd.xlane.f32.xlu0 %v830_v53  ;;  %v274_v53 = vcombine.low %v1104_v63, %v1111_v10 }
  0x5d   :  { %315 = vmatpush1.xpose.msra.mxu0 %v67_v4  ;;  %385 = vmatpush1.xpose.msra.mxu1 %v69_v5  ;;  %v104_v4 = vld [vmem:[#allocation7 + $0x128] sm:$0xff]  ;;  %v106_v5 = vld [vmem:[#allocation7 + $0x138] sm:$0xff] }
  0x5e   :  { %424 = vmatprep.subr.mxu0 %v192_v7  ;;  %494 = vmatprep.subr.mxu1 %v194_v8  ;;  %v96_v7 = vld [vmem:[#allocation7 + $0xe8] sm:$0xff]  ;;  %v98_v8 = vld [vmem:[#allocation7 + $0xf8] sm:$0xff] }
  0x60   :  { %349 = vmatmul.mubr.f32.vlgmr.msra.gmra.mxu0 %v236_v13  ;;  %419 = vmatmul.mubr.f32.vlgmr.msra.gmra.mxu1 %v238_v14  ;;  %v88_v13 = vld [vmem:[#allocation7 + $0xa8] sm:$0xff]  ;;  %v90_v14 = vld [vmem:[#allocation7 + $0xb8] sm:$0xff] }
  0x61   :  { %425 = vmatpush1.xpose.msra.mxu0 %v191_v18  ;;  %495 = vmatpush1.xpose.msra.mxu1 %v193_v19  ;;  %v82_v18 = vld [vmem:[#allocation7 + $0x78] sm:$0xff]  ;;  %v79_v19 = vld [vmem:[#allocation7 + $0x60] sm:$0xff] }
  0x62   :  { %426 = vmatprep.subr.mxu0 %v184_v21  ;;  %496 = vmatprep.subr.mxu1 %v186_v22  ;;  %v72_v21 = vld [vmem:[#allocation7 + $0x28] sm:$0xff]  ;;  %v74_v22 = vld [vmem:[#allocation7 + $0x38] sm:$0xff] }
  0x63   :  { %488 = vmatprep.mubr.f32.mxu0 %v273_v48  ;;  %558 = vmatprep.mubr.f32.mxu1 %v275_v49  ;;  %v71_v48 = vld [vmem:[#allocation7 + $0x20] sm:$0xff]  ;;  %v73_v49 = vld [vmem:[#allocation7 + $0x30] sm:$0xff] }
  0x65   :  { %427 = vmatpush1.xpose.msra.mxu0 %v183_v31  ;;  %497 = vmatpush1.xpose.msra.mxu1 %v185_v23 }
  0x66   :  { %428 = vmatprep.subr.mxu0 %v176_v24  ;;  %498 = vmatprep.subr.mxu1 %v178_v25 }
  0x69   :  { %429 = vmatpush1.xpose.msra.mxu0 %v175_v26  ;;  %499 = vmatpush1.xpose.msra.mxu1 %v177_v27 }
  0x6a   :  { %430 = vmatprep.subr.mxu0 %v168_v28  ;;  %500 = vmatprep.subr.mxu1 %v170_v29 }
  0x6d   :  { %431 = vmatpush1.xpose.msra.mxu0 %v167_v30  ;;  %501 = vmatpush1.xpose.msra.mxu1 %v169_v32 }
  0x6e   :  { %432 = vmatprep.subr.mxu0 %v160_v33  ;;  %502 = vmatprep.subr.mxu1 %v162_v36 }
  0x71   :  { %433 = vmatpush1.xpose.msra.mxu0 %v159_v37  ;;  %503 = vmatpush1.xpose.msra.mxu1 %v161_v38 }
  0x72   :  { %434 = vmatprep.subr.mxu0 %v152_v39  ;;  %504 = vmatprep.subr.mxu1 %v154_v34 }
  0x75   :  { %435 = vmatpush1.xpose.msra.mxu0 %v151_v35  ;;  %505 = vmatpush1.xpose.msra.mxu1 %v153_v40 }
  0x76   :  { %436 = vmatprep.subr.mxu0 %v144_v41  ;;  %506 = vmatprep.subr.mxu1 %v146_v42 }
  0x79   :  { %437 = vmatpush1.xpose.msra.mxu0 %v143_v43  ;;  %507 = vmatpush1.xpose.msra.mxu1 %v145_v44 }
  0x7a   :  { %438 = vmatprep.subr.mxu0 %v136_v45  ;;  %508 = vmatprep.subr.mxu1 %v138_v46 }
  0x7d   :  { %439 = vmatpush1.xpose.msra.mxu0 %v135_v47  ;;  %509 = vmatpush1.xpose.msra.mxu1 %v137_v50 }
  0x7e   :  { %440 = vmatprep.subr.mxu0 %v128_v51  ;;  %510 = vmatprep.subr.mxu1 %v130_v54 }
  0x81   :  { %441 = vmatpush1.xpose.msra.mxu0 %v127_v55  ;;  %511 = vmatpush1.xpose.msra.mxu1 %v129_v56 }
  0x82   :  { %442 = vmatprep.subr.mxu0 %v120_v57  ;;  %512 = vmatprep.subr.mxu1 %v122_v58 }
  0x85   :  { %443 = vmatpush1.xpose.msra.mxu0 %v119_v61  ;;  %513 = vmatpush1.xpose.msra.mxu1 %v121_v62 }
  0x86   :  { %444 = vmatprep.subr.mxu0 %v112_v0  ;;  %514 = vmatprep.subr.mxu1 %v114_v1 }
  0x89   :  { %445 = vmatpush1.xpose.msra.mxu0 %v111_v60  ;;  %515 = vmatpush1.xpose.msra.mxu1 %v113_v3 }
  0x8a   :  { %446 = vmatprep.subr.mxu0 %v104_v4  ;;  %516 = vmatprep.subr.mxu1 %v106_v5 }
  0x8d   :  { %447 = vmatpush1.xpose.msra.mxu0 %v103_v2  ;;  %517 = vmatpush1.xpose.msra.mxu1 %v105_v6 }
  0x8e   :  { %448 = vmatprep.subr.mxu0 %v96_v7  ;;  %518 = vmatprep.subr.mxu1 %v98_v8 }
  0x91   :  { %449 = vmatpush1.xpose.msra.mxu0 %v95_v11  ;;  %519 = vmatpush1.xpose.msra.mxu1 %v97_v12 }
  0x92   :  { %450 = vmatprep.subr.mxu0 %v88_v13  ;;  %520 = vmatprep.subr.mxu1 %v90_v14 }
  0x95   :  { %451 = vmatpush1.xpose.msra.mxu0 %v87_v15  ;;  %521 = vmatpush1.xpose.msra.mxu1 %v89_v16 }
  0x96   :  { %452 = vmatprep.subr.mxu0 %v80_v17  ;;  %522 = vmatprep.subr.mxu1 %v82_v18 }
  0x99   :  { %453 = vmatpush1.xpose.msra.mxu0 %v79_v19  ;;  %523 = vmatpush1.xpose.msra.mxu1 %v81_v20 }
  0x9a   :  { %454 = vmatprep.subr.mxu0 %v72_v21  ;;  %524 = vmatprep.subr.mxu1 %v74_v22 }
  0x9d   :  { %455 = vmatpush1.xpose.msra.mxu0 %v71_v48  ;;  %525 = vmatpush1.xpose.msra.mxu1 %v73_v49 }
  0xa0   :  { %489 = vmatmul.mubr.f32.vlgmr.msra.gmra.mxu0 %v272_v52  ;;  %559 = vmatmul.mubr.f32.vlgmr.msra.gmra.mxu1 %v274_v53 }
  0xe4   :  { %v837_v26 = vpop.xlane.xlu0 %836 }
  0xe5   :  { %v838_v27 = vmax.f32 %v837_v26, 1e-08 }
  0xe7   :  { %893 = vrsqrt.f32 %v838_v27 }
  0xf4   :  { %v894_v33 = vpop.eup %893 }
 0x120   :  { %v350_v31 = vpop.f32.mrf.mxu0  ;;  %v420_v23 = vpop.f32.mrf.mxu1 }
 0x121   :  { %v421_v28 = vadd.f32 %v420_v23, %v350_v31 }
 0x122   :  { %v352_v24 = vpop.f32.mrf.mxu0  ;;  %v422_v25 = vpop.f32.mrf.mxu1 }
 0x160   :  { %v490_v29 = vpop.f32.mrf.mxu0  ;;  %v560_v30 = vpop.f32.mrf.mxu1 }
 0x161   :  { %v491_v32 = vadd.f32 %v490_v29, %v421_v28 }
 0x162   :  { %v492_v63 = vpop.f32.mrf.mxu0  ;;  %v562_v9 = vpop.f32.mrf.mxu1 }
 0x163   :  { %v561_v10 = vadd.f32 %v560_v30, %v491_v32 }
 0x165   :  { %v848_v36 = vmul.f32 %v874_v59, %v561_v10 }
 0x167   :  { %v849_v37 = vmul.f32 %v894_v33, %v848_v36 }
 0x169   :  { %v850_v38 = vmax.f32 %v849_v37, 0.0 }
 0x16b   :  { %851 = vst [vmem:[#allocation9] sm:$0xff] %v850_v38 }
 0x16c   :  { %856 = vsyncadd [#allocation6], 96  ;;  %s968_s27 = smov [#allocation9]  }
 0x16d   :  { %s857_s28 = sshll.u32 %s968_s27, 4  ;;  %s858_s28 = int_to_ptr.vmem [resolvable:$true] %s857_s28 }
 0x16e   :  { %s935_s29 = scalar_lea.vmem %s858_s28, 32  ;;  %s939_s30 = scalar_lea.vmem %s858_s28, 128 }
 0x16f   :  { %p936_p10 = scmp.ne.s32.totalorder %s858_s28, %s935_s29  ;;  %p940_p11 = scmp.lt.s32.totalorder %s858_s28, %s858_s28 }
 0x170   :  { %p941_p12 = scmp.lt.s32.totalorder %s939_s30, %s935_s29 }
 0x172   :  { %p942_p13 = por %p941_p12, %p940_p11 }
 0x174   :  { %p943_p0 = pnand %p942_p13, %p936_p10 }
 0x176   :  { %946 = shalt.err (!%p943_p0)
}
 0x177   :  { %s969_s2 = smov 32   ;;  %s970_s4 = smov 2  }
 0x178   :  { %863 = dma.vmem_to_hbm [thread:$0]  %s858_s28, 32, %s1136_s3, [#allocation6], %s969_s2, %s969_s2, %s970_s4  }
 0x179   :  { %959 = dma.done.wait [#allocation6], 128  }
 0x17a   :  { %960 = vsyncadd [#allocation6], 4294967168 }
 0x17b   :  { %867 = vsyncpa [#allocation5], 1 }
 0x17c   :  { %868 = vsyncpa [#allocation8], 1 }
 0x17d   :  { %869 = vsyncpa [#allocation6], 1 }

</bundles_post_ra>
